<compile_context>
chip_gen: v5e
topology: v5e:2x2
jax: 0.10.0
libtpu: 0.0.40
codegen_flags: <defaults>
</compile_context>

<pallas_src>
import functools

import jax
import jax.numpy as jnp
from jax.experimental import pallas as pl
from jax.experimental.pallas import tpu as pltpu

LANES = 128   # hidden width / lane width
K_IN = 32     # input features padded 27 -> 32 (sublane-aligned, tiny wrapper pad)
N_OUT = 16    # output lanes stored by the kernel (logits live in lanes 0..8)


def _round_up(n, m):
    return ((n + m - 1) // m) * m


def _mlp_kernel(x_ref, w_ref, b_ref, o_ref):
    """Fused 3-layer MLP on one (TB, K_IN) batch tile.

    x_ref: (TB, 32) bf16      -- 27 real features, lanes 27..31 are zero
    w_ref: (3, 128, 128) bf16 -- zero-padded W1 / W2 / W3, stacked
    b_ref: (3, 128) f32       -- zero-padded b1 / b2 / b3, stacked
    o_ref: (TB, 16) f32       -- logits in lanes 0..8, lanes 9..15 exactly 0
    """
    x = x_ref[...]
    b = b_ref[...]

    # Layer 1: (TB,32) @ (32,128) + b1 -> ReLU.  Rows 27..31 of W1 are zero, so
    # the padded input lanes are inert.
    h1 = jnp.dot(x, w_ref[0, :K_IN, :], preferred_element_type=jnp.float32)
    h1 = jnp.maximum(h1 + b[0:1, :], 0.0)

    # Layer 2: (TB,128) @ (128,128) + b2 -> ReLU (lanes 64..127 stay exactly 0).
    h2 = jnp.dot(h1.astype(jnp.bfloat16), w_ref[1], preferred_element_type=jnp.float32)
    h2 = jnp.maximum(h2 + b[1:2, :], 0.0)

    # Layer 3: (TB,128) @ (128,128) + b3 (lanes 9..127 stay exactly 0); only the
    # first 16 lanes are written back -> 8x less HBM writeback than 128-lane f32.
    out = jnp.dot(h2.astype(jnp.bfloat16), w_ref[2], preferred_element_type=jnp.float32)
    out = out + b[2:3, :]
    o_ref[...] = out[:, :N_OUT].astype(o_ref.dtype)


@functools.partial(jax.jit, static_argnames=("block_b",))
def tictactoe_forward(x, w_pack, b_pack, *, block_b=2048):
    """x: (B, 27) float32.  Returns (B, 9) float32 logits."""
    B, F = x.shape

    # Balanced batch tiling:
    #   * >=2 grid steps so the "parallel" batch axis spans both v7x TensorCores,
    #   * tiles up to block_b rows to amortize per-grid-step overhead,
    #   * cdiv-based split caps padding waste at <16 rows per tile.
    n_tiles = max(2, pl.cdiv(B, block_b))
    TB = _round_up(pl.cdiv(B, n_tiles), 16)   # bf16 sublane packing -> multiple of 16
    B_pad = n_tiles * TB

    # One tiny fused wrapper op: batch pad (B -> B_pad), feature pad (27 -> 32),
    # bf16 cast.  64 B/row of kernel input instead of 256 B/row (old 128-lane f32).
    x_pad = jnp.zeros((B_pad, K_IN), jnp.bfloat16)
    x_pad = x_pad.at[:B, :F].set(x.astype(jnp.bfloat16))

    flops = 2 * B_pad * (K_IN * LANES + LANES * LANES + LANES * LANES)
    bytes_accessed = (B_pad * K_IN * 2 + 3 * LANES * LANES * 2
                      + 3 * LANES * 4 + B_pad * N_OUT * 4)

    out = pl.pallas_call(
        _mlp_kernel,
        out_shape=jax.ShapeDtypeStruct((B_pad, N_OUT), jnp.float32),
        grid_spec=pl.GridSpec(
            grid=(n_tiles,),
            in_specs=[
                # activations stream per batch tile
                pl.BlockSpec((TB, K_IN), lambda i: (i, 0)),
                # packed weights / biases: constant block index -> fetched once,
                # VMEM-resident for the whole grid.  (A 2nd pipeline buffer on
                # them is wasted VMEM, but headroom is huge even on v7x, so we
                # keep default buffering instead of a non-portable Buffered(1).)
                pl.BlockSpec((3, LANES, LANES), lambda i: (0, 0, 0)),
                pl.BlockSpec((3, LANES), lambda i: (0, 0)),
            ],
            out_specs=pl.BlockSpec((TB, N_OUT), lambda i: (i, 0)),
        ),
        compiler_params=pltpu.CompilerParams(
            dimension_semantics=("parallel",)),  # v7x: batch tiles split across 2 TCs
        cost_estimate=pl.CostEstimate(
            flops=flops, transcendentals=0, bytes_accessed=bytes_accessed),
    )(x_pad, w_pack, b_pack)
    return out[:B, :9]


def init_params(key):
    """PyTorch nn.Linear default init: uniform +/- 1/sqrt(fan_in). Unpadded f32 params."""
    ks = jax.random.split(key, 6)

    def lin(kw, kb, fan_in, fan_out):
        bound = 1.0 / jnp.sqrt(fan_in)
        w = jax.random.uniform(kw, (fan_in, fan_out), jnp.float32, -bound, bound)
        b = jax.random.uniform(kb, (fan_out,), jnp.float32, -bound, bound)
        return w, b

    return [lin(ks[0], ks[1], 27, 128),
            lin(ks[2], ks[3], 128, 64),
            lin(ks[4], ks[5], 64, 9)]


def pack_params(params):
    """Zero-pad every layer to (128,128)/(128,) and stack.  Padded entries MUST
    stay exactly zero: the lane-dense scheme's correctness depends on it."""
    (w1, b1), (w2, b2), (w3, b3) = params
    w_pack = jnp.zeros((3, LANES, LANES), jnp.float32)
    w_pack = w_pack.at[0, :27, :128].set(w1)
    w_pack = w_pack.at[1, :128, :64].set(w2)
    w_pack = w_pack.at[2, :64, :9].set(w3)
    b_pack = jnp.zeros((3, LANES), jnp.float32)
    b_pack = b_pack.at[0, :128].set(b1)
    b_pack = b_pack.at[1, :64].set(b2)
    b_pack = b_pack.at[2, :9].set(b3)
    return w_pack.astype(jnp.bfloat16), b_pack


def reference_forward_f32(x, params):
    (w1, b1), (w2, b2), (w3, b3) = params
    h1 = jnp.maximum(x @ w1 + b1, 0.0)
    h2 = jnp.maximum(h1 @ w2 + b2, 0.0)
    return h2 @ w3 + b3


def reference_forward_bf16(x, params):
    """Same bf16-input / f32-accumulate numerics as the kernel (for a tight check)."""
    (w1, b1), (w2, b2), (w3, b3) = params
    bf = jnp.bfloat16
    h1 = jnp.maximum(
        jnp.dot(x.astype(bf), w1.astype(bf), preferred_element_type=jnp.float32) + b1, 0.0)
    h2 = jnp.maximum(
        jnp.dot(h1.astype(bf), w2.astype(bf), preferred_element_type=jnp.float32) + b2, 0.0)
    return jnp.dot(h2.astype(bf), w3.astype(bf), preferred_element_type=jnp.float32) + b3


if __name__ == "__main__":
    key = jax.random.PRNGKey(0)
    k_x, k_p = jax.random.split(key)
    B = 8
    # Tic-tac-toe board one-hot encoding: 9 cells x 3 states = 27 features.
    x = jax.random.normal(k_x, (B, 27), dtype=jnp.float32)
    params = init_params(k_p)
    w_pack, b_pack = pack_params(params)

    out = tictactoe_forward(x, w_pack, b_pack)
    out = jax.block_until_ready(out)

    ref_matched = reference_forward_bf16(x, params)   # same precision as kernel
    ref_f32 = reference_forward_f32(x, params)        # original PyTorch-f32 semantics

    assert out.shape == (B, 9), out.shape
    assert jnp.allclose(out, ref_matched, atol=1e-3, rtol=1e-3), "mismatch vs bf16 reference"
    assert jnp.allclose(out, ref_f32, atol=5e-2, rtol=5e-2), "mismatch vs f32 reference"
    print("KERNEL_OK")
</pallas_src>

<mosaic_0001>
module attributes {stable_mosaic.version = 11 : i64} {
  func.func @_mlp_kernel(%arg0: i32, %arg1: memref<16x32xbf16, #tpu.memory_space<vmem>>, %arg2: memref<3x128x128xbf16, #tpu.memory_space<vmem>>, %arg3: memref<3x128xf32, #tpu.memory_space<vmem>>, %arg4: memref<16x16xf32, #tpu.memory_space<vmem>>) attributes {dimension_semantics = [#tpu.dimension_semantics<parallel>], iteration_bounds = array<i64: 2>, scalar_prefetch = 0 : i64, scratch_operands = 0 : i64, tpu.core_type = #tpu.core_type<tc>, window_params = [{transform_indices = @transform_0, window_bounds = array<i64: 16, 32>}, {pipeline_mode = #tpu.pipeline_mode<synchronous>, transform_indices = @transform_1, window_bounds = array<i64: 3, 128, 128>}, {pipeline_mode = #tpu.pipeline_mode<synchronous>, transform_indices = @transform_2, window_bounds = array<i64: 3, 128>}, {transform_indices = @transform_3, window_bounds = array<i64: 16, 16>}]} {
    %c0 = arith.constant 0 : index
    %c0_0 = arith.constant 0 : index
    %0 = vector.load %arg1[%c0, %c0_0] : memref<16x32xbf16, #tpu.memory_space<vmem>>, vector<16x32xbf16>
    %c0_1 = arith.constant 0 : index
    %c0_2 = arith.constant 0 : index
    %1 = vector.load %arg3[%c0_1, %c0_2] : memref<3x128xf32, #tpu.memory_space<vmem>>, vector<3x128xf32>
    %c0_3 = arith.constant 0 : index
    %c0_4 = arith.constant 0 : index
    %c0_5 = arith.constant 0 : index
    %2 = vector.load %arg2[%c0_3, %c0_4, %c0_5] : memref<3x128x128xbf16, #tpu.memory_space<vmem>>, vector<1x32x128xbf16>
    %3 = vector.shape_cast %2 : vector<1x32x128xbf16> to vector<32x128xbf16>
    %cst = arith.constant dense<0.000000e+00> : vector<16x128xf32>
    %4 = tpu.matmul %0, %3, %cst {dimension_numbers = #tpu.dot_dimension_numbers<[1], [0], [0], [1], [0, 0, 1, 1], [], []>} : vector<16x32xbf16>, vector<32x128xbf16>, vector<16x128xf32> -> vector<16x128xf32>
    %5 = vector.extract_strided_slice %1 {offsets = [0, 0], sizes = [1, 128], strides = [1, 1]} : vector<3x128xf32> to vector<1x128xf32>
    %6 = vector.broadcast %5 : vector<1x128xf32> to vector<16x128xf32>
    %7 = arith.addf %4, %6 : vector<16x128xf32>
    %cst_6 = arith.constant 0.000000e+00 : f32
    %8 = vector.broadcast %cst_6 : f32 to vector<16x128xf32>
    %9 = arith.maximumf %7, %8 : vector<16x128xf32>
    %10 = arith.truncf %9 : vector<16x128xf32> to vector<16x128xbf16>
    %c1 = arith.constant 1 : index
    %c0_7 = arith.constant 0 : index
    %c0_8 = arith.constant 0 : index
    %11 = vector.load %arg2[%c1, %c0_7, %c0_8] : memref<3x128x128xbf16, #tpu.memory_space<vmem>>, vector<1x128x128xbf16>
    %12 = vector.shape_cast %11 : vector<1x128x128xbf16> to vector<128x128xbf16>
    %cst_9 = arith.constant dense<0.000000e+00> : vector<16x128xf32>
    %13 = tpu.matmul %10, %12, %cst_9 {dimension_numbers = #tpu.dot_dimension_numbers<[1], [0], [0], [1], [0, 0, 1, 1], [], []>} : vector<16x128xbf16>, vector<128x128xbf16>, vector<16x128xf32> -> vector<16x128xf32>
    %14 = vector.extract_strided_slice %1 {offsets = [1, 0], sizes = [1, 128], strides = [1, 1]} : vector<3x128xf32> to vector<1x128xf32>
    %15 = vector.broadcast %14 : vector<1x128xf32> to vector<16x128xf32>
    %16 = arith.addf %13, %15 : vector<16x128xf32>
    %cst_10 = arith.constant 0.000000e+00 : f32
    %17 = vector.broadcast %cst_10 : f32 to vector<16x128xf32>
    %18 = arith.maximumf %16, %17 : vector<16x128xf32>
    %19 = arith.truncf %18 : vector<16x128xf32> to vector<16x128xbf16>
    %c2 = arith.constant 2 : index
    %c0_11 = arith.constant 0 : index
    %c0_12 = arith.constant 0 : index
    %20 = vector.load %arg2[%c2, %c0_11, %c0_12] : memref<3x128x128xbf16, #tpu.memory_space<vmem>>, vector<1x128x128xbf16>
    %21 = vector.shape_cast %20 : vector<1x128x128xbf16> to vector<128x128xbf16>
    %cst_13 = arith.constant dense<0.000000e+00> : vector<16x128xf32>
    %22 = tpu.matmul %19, %21, %cst_13 {dimension_numbers = #tpu.dot_dimension_numbers<[1], [0], [0], [1], [0, 0, 1, 1], [], []>} : vector<16x128xbf16>, vector<128x128xbf16>, vector<16x128xf32> -> vector<16x128xf32>
    %23 = vector.extract_strided_slice %1 {offsets = [2, 0], sizes = [1, 128], strides = [1, 1]} : vector<3x128xf32> to vector<1x128xf32>
    %24 = vector.broadcast %23 : vector<1x128xf32> to vector<16x128xf32>
    %25 = arith.addf %22, %24 : vector<16x128xf32>
    %26 = vector.extract_strided_slice %25 {offsets = [0, 0], sizes = [16, 16], strides = [1, 1]} : vector<16x128xf32> to vector<16x16xf32>
    %c0_14 = arith.constant 0 : index
    %c0_15 = arith.constant 0 : index
    %27 = vector.load %arg4[%c0_14, %c0_15] : memref<16x16xf32, #tpu.memory_space<vmem>>, vector<16x16xf32>
    tpu.vector_store %arg4[%c0_14, %c0_15], %26 {strides = array<i32>} : memref<16x16xf32, #tpu.memory_space<vmem>>, vector<16x16xf32>,
    return
  }
  func.func @transform_0(%arg0: i32) -> (i32, i32) {
    %c0_i32 = arith.constant 0 : i32
    %c0_i32_0 = arith.constant 0 : i32
    return %arg0, %c0_i32 : i32, i32
  }
  func.func @transform_1(%arg0: i32) -> (i32, i32, i32) {
    %c0_i32 = arith.constant 0 : i32
    %c0_i32_0 = arith.constant 0 : i32
    %c0_i32_1 = arith.constant 0 : i32
    %c0_i32_2 = arith.constant 0 : i32
    return %c0_i32, %c0_i32_0, %c0_i32_1 : i32, i32, i32
  }
  func.func @transform_2(%arg0: i32) -> (i32, i32) {
    %c0_i32 = arith.constant 0 : i32
    %c0_i32_0 = arith.constant 0 : i32
    %c0_i32_1 = arith.constant 0 : i32
    return %c0_i32, %c0_i32_0 : i32, i32
  }
  func.func @transform_3(%arg0: i32) -> (i32, i32) {
    %c0_i32 = arith.constant 0 : i32
    %c0_i32_0 = arith.constant 0 : i32
    return %arg0, %c0_i32 : i32, i32
  }
}

</mosaic_0001>

<bundles_post_ra>
// kernel: tictactoe_forward.1
= control target key start
LH: loop header
LB: loop body
LE: loop exit
PB: predicated region body
PF: predicated region fallthrough
CT: control target
= control target key end

     0   :  { %8 = vsyncpa [#allocation3], 0  ;;  %s667_s12 = smov 0   ;;  %s694_s0 = inlined_call_operand.vmem [shape: bf16[32,32], index: 0, kind: input, shape index: {}]   ;;  %s695_s1 = inlined_call_operand.hbm [shape: bf16[3,128,128], index: 1, kind: input, shape index: {}]   ;;  %s696_s2 = inlined_call_operand.vmem [shape: f32[3,128], index: 2, kind: input, shape index: {}]   ;;  %s697_s3 = inlined_call_operand.vmem [shape: f32[32,16], index: 3, kind: output, shape index: {}]  }
   0x1 LB: > { %s124_s15 = sshll.u32 %s695_s1, 4  ;;  %s472_s16 = sadd.s32 4294967295, %s642_s12   ;;  %s642_s12 = sphi %s667_s12, %s14_s12   ;;  %s125_s15 = int_to_ptr.hbm [resolvable:$true] %s124_s15 }
   0x2   : > { %p474_p0 = scmp.ge.s32.totalorder %s642_s12, 1  ;;  %p113_p1 = scmp.lt.s32.totalorder %s642_s12, 3 }
   0x3   : > { %p589_p2 = scmp.eq.s32.totalorder %s472_s16, 0  ;;  %s644_s17 = smov [#allocation2]  }
   0x4   : > { %p114_p3 = pnand %p474_p0, %p113_p1  ;;  %s126_s18 = sshll.u32 %s644_s17, 4  ;;  %s127_s18 = int_to_ptr.vmem [resolvable:$true] %s126_s18 }
   0x5   : > { %s645_s19 = smov 64   ;;  %s646_s20 = smov 4  }
   0x6   : > { %p585_p4 = pneg %p114_p3  ;;  %154 = sbr.rel (%p114_p3) target bundleno = 443 (0x1bb), region = 32 }
   0x8   : > { %p586_p5 = pnand %p589_p2, %p585_p4 }
   0xa   : > { %588 = dma.hbm_to_vmem [thread:$0]  (!%p586_p5), %s125_s15, 3072, %s127_s18, [#allocation3], %s645_s19, %s645_s19, %s646_s20  }
   0xb   : > { %637 = dma.done.wait (%p589_p2), [#allocation3], 3072  }
   0xc   : > { %639 = vsyncadd (%p589_p2), [#allocation3], 4294964224  ;;  %s479_s21 = sshll.u32 %s472_s16, 1  ;;  %v564_v0 = vld [vmem:[#allocation2 + $0x8] sm:$0xff]  ;;  %v572_v1 = vld [vmem:[#allocation2 + $0x78] sm:$0xff]  ;;  %vm217_vm0 = vcmask 261120  }
   0xd   : > { %p180_p6 = scmp.lt.s32.totalorder %s479_s21, 3  ;;  %227 = vmatpush.bf16.msra.mxu0 %v564_v0  ;;  %v563_v2 = vld [vmem:[#allocation2] sm:$0xff]  ;;  %304 = vmatpush.bf16.msra.mxu1 %v572_v1  ;;  %v571_v3 = vld [vmem:[#allocation2 + $0x70] sm:$0xff]  ;;  %v570_v5 = vld [vmem:[#allocation2 + $0x68] sm:$0xff]  ;;  %vm401_vm1 = vcmask 130048  }
   0xe   : > { %v569_v6 = vld [vmem:[#allocation2 + $0x60] sm:$0xff]  ;;  %v568_v7 = vld [vmem:[#allocation2 + $0x58] sm:$0xff]  ;;  %v567_v8 = vld [vmem:[#allocation2 + $0x50] sm:$0xff] }
   0xf   : > { %s699_s21 = smov (!%p180_p6, %s479_s21), 3  ;;  %v566_v9 = vld [vmem:[#allocation2 + $0x48] sm:$0xff]  ;;  %v565_v10 = vld [vmem:[#allocation2 + $0x40] sm:$0xff]  ;;  %v580_v11 = vld [vmem:[#allocation2 + $0xb8] sm:$0xff] }
  0x10   : > { %s480_s22 = sshll.u32 %s699_s21, 2  ;;  %387 = vmatpush.bf16.msra.mxu2 %v580_v11  ;;  %v579_v12 = vld [vmem:[#allocation2 + $0xb0] sm:$0xff]  ;;  %v578_v13 = vld [vmem:[#allocation2 + $0xa8] sm:$0xff]  ;;  %v577_v14 = vld [vmem:[#allocation2 + $0xa0] sm:$0xff]  ;;  %s482_s28 = sshll.u32 %s699_s21, 3 }
  0x11   : > { %s183_s25 = scalar_lea.vmem %s694_s0, %s480_s22  ;;  %228 = vmatpush.bf16.msra.mxu0 %v563_v2  ;;  %305 = vmatpush.bf16.msra.mxu1 %v571_v3  ;;  %v194_v15 = vld [vmem:[%s696_s2] sm:$0x7]  ;;  %v576_v24 = vld [vmem:[#allocation2 + $0x98] sm:$0xff]  ;;  %v575_v25 = vld [vmem:[#allocation2 + $0x90] sm:$0xff]  ;;  %s189_s4 = scalar_lea.vmem %s697_s3, %s482_s28 }
  0x12   : > { %v562_v4 = vld [vmem:[%s183_s25] sm:$0xff]  ;;  %v199_v17 = vperm.slane %v194_v15, 0  ;;  %v574_v26 = vld [vmem:[#allocation2 + $0x88] sm:$0xff]  ;;  %v255_v29 = vperm.slane %v194_v15, 1  ;;  %v338_v36 = vperm.slane %v194_v15, 2 }
  0x13   : > { %v573_v27 = vld [vmem:[#allocation2 + $0x80] sm:$0xff] }
  0x14   : > { %495 = vmatmul.msk.bf16.vlgmr.msra.gmra.mxu0 %vm217_vm0, %v562_v4  ;;  %388 = vmatpush.bf16.msra.mxu2 %v579_v12 }
  0x15   : > { %306 = vmatpush.bf16.msra.mxu1 %v570_v5 }
  0x18   : > { %389 = vmatpush.bf16.msra.mxu2 %v578_v13 }
  0x19   : > { %307 = vmatpush.bf16.msra.mxu1 %v569_v6 }
  0x1c   : > { %390 = vmatpush.bf16.msra.mxu2 %v577_v14 }
  0x1d   : > { %308 = vmatpush.bf16.msra.mxu1 %v568_v7 }
  0x20   : > { %391 = vmatpush.bf16.msra.mxu2 %v576_v24 }
  0x21   : > { %309 = vmatpush.bf16.msra.mxu1 %v567_v8 }
  0x24   : > { %392 = vmatpush.bf16.msra.mxu2 %v575_v25 }
  0x25   : > { %310 = vmatpush.bf16.msra.mxu1 %v566_v9 }
  0x28   : > { %393 = vmatpush.bf16.msra.mxu2 %v574_v26 }
  0x29   : > { %311 = vmatpush.bf16.msra.mxu1 %v565_v10 }
  0x2c   : > { %394 = vmatpush.bf16.msra.mxu2 %v573_v27 }
  0x91   : > { %v230_v16 = vpop.f32.mrf.mxu0 }
  0x92   : > { %v231_v18 = vadd.f32 %v230_v16, %v199_v17 }
  0x94   : > { %v235_v21 = vmax.f32 %v231_v18, 0.0 }
  0x99   : > { %v232_v19 = vpop.f32.mrf.mxu0 }
  0x9a   : > { %v233_v20 = vadd.f32 %v232_v19, %v199_v17 }
  0x9c   : > { %v236_v22 = vmax.f32 %v233_v20, 0.0 }
  0x9e   : > { %v237_v23 = vpack.c.bf16 %v236_v22, %v235_v21 }
  0xa0   : > { %312 = vmatmul.bf16.vlgmr.msra.gmra.mxu1 %v237_v23 }
 0x11d   : > { %v313_v28 = vpop.f32.mrf.mxu1 }
 0x11e   : > { %v314_v30 = vadd.f32 %v313_v28, %v255_v29 }
 0x120   : > { %v318_v33 = vmax.f32 %v314_v30, 0.0 }
 0x125   : > { %v315_v31 = vpop.f32.mrf.mxu1 }
 0x126   : > { %v316_v32 = vadd.f32 %v315_v31, %v255_v29 }
 0x128   : > { %v319_v34 = vmax.f32 %v316_v32, 0.0 }
 0x12a   : > { %v320_v35 = vpack.c.bf16 %v319_v34, %v318_v33 }
 0x12c   : > { %395 = vmatmul.bf16.vlgmr.msra.gmra.mxu2 %v320_v35 }
 0x1af   : > { %v396_v37 = vpop.f32.mrf.mxu2 }
 0x1b0   : > { %v397_v38 = vadd.f32 %v396_v37, %v338_v36 }
 0x1b2   : > { %402 = vst.msk [vmem:[%s189_s4] sm:$0xff] %vm401_vm1, %v397_v38 }
 0x1b7   : > { %v398_v39 = vpop.f32.mrf.mxu2 }
 0x1b8   : > { %v399_v40 = vadd.f32 %v398_v39, %v338_v36 }
 0x1ba   : > { %403 = vst.msk [vmem:[%s189_s4 + $0x8] sm:$0xff] %vm401_vm1, %v399_v40 }
 0x1bb PF: > { %s14_s12 = sadd.s32 1, %s642_s12  }
 0x1bc   : > { %p11_p7 = scmp.ge.s32.totalorder %s14_s12, 4  }
 0x1be   :  { %13 = sbr.rel (!%p11_p7) target bundleno = 1 (0x1), region = 69 }
 0x1c3   :  { %426 = vsyncpa [#allocation3], 1 }
 0x1c4   :  { %428 = vsyncpa [#allocation3 + $0x1], 1 }

</bundles_post_ra>
